<compile_context>
chip_gen: v7x
topology: tpu7x:2x2x1
jax: 0.10.0
libtpu: 0.0.40
codegen_flags: <defaults>
</compile_context>

<pallas_src>
import jax
import jax.numpy as jnp
from jax.experimental import pallas as pl
from jax.experimental.pallas import tpu as pltpu

LANES = 128
SUBLANES = 8
MAX_TILE_BYTES = 2 * 1024 * 1024        # per-input VMEM tile (f32: 4096 rows)
VMEM_LIMIT_BYTES = 32 * 1024 * 1024     # safe on v5e/v6e (128 MiB) and v7x (64 MiB)


def _cdiv(a, b):
    return -(-a // b)


def _round_up(a, b):
    return _cdiv(a, b) * b


def _device_kind() -> str:
    try:
        return jax.devices()[0].device_kind.lower()
    except Exception:  # pragma: no cover - be robust if device query fails
        return ""


def _has_bf16_valu(kind: str) -> bool:
    # bf16 VPU arithmetic exists on v6e (Trillium) and v7x; NOT on v5e.
    return ("v6" in kind) or ("v7" in kind) or ("7x" in kind) or ("trillium" in kind)


def _num_core_partials(kind: str) -> int:
    # Chips whose grid "parallel" axis can actually land on >1 TensorCore.
    if ("v7" in kind) or ("7x" in kind):
        return 2                          # 2 TensorCores per chip
    if "v4" in kind or "v5p" in kind:
        return 2                          # megacore
    return 1                              # v5e / v6e: single TensorCore


def _make_kernel(tile_r, steps, full_rows, n_valid, compute_dtype):
    """Build the streaming hinge-sum kernel with static tiling params closed over."""

    def kernel(pos_ref, neg_ref, acc_ref):
        c = pl.program_id(0)              # per-core partial index ("parallel")
        i = pl.program_id(1)              # row-tile index ("arbitrary")

        @pl.when(i == 0)
        def _init():
            acc_ref[...] = jnp.zeros_like(acc_ref)

        # Hinge in compute_dtype (bf16 on v6e/v7x bf16 inputs; else f32),
        # accumulate in f32.
        pos = pos_ref[...].astype(compute_dtype)
        neg = neg_ref[...].astype(compute_dtype)
        one = jnp.asarray(1, compute_dtype)
        zero = jnp.asarray(0, compute_dtype)
        hinge = jnp.maximum(one - pos + neg, zero).astype(jnp.float32)

        # Nominal (unclamped) position of this block in the flattened array.
        nominal_block = c * steps + i
        row_start = nominal_block * tile_r
        # Over-run iff this block touches rows beyond the fully-valid range.
        overrun = row_start + tile_r > full_rows

        def fold(h):
            # (tile_r, 128) -> (tile_r/8, 8, 128): stays on (8,128) vreg tiles,
            # so the axis-0 sum is pure elementwise VPU adds (no relayout).
            return h.reshape(tile_r // SUBLANES, SUBLANES, LANES).sum(axis=0)

        @pl.when(jnp.logical_not(overrun))
        def _fast():
            acc_ref[...] += fold(hinge)

        @pl.when(overrun)
        def _masked():
            # Mask by true flattened element index: covers (a) the partial last
            # block, (b) clamped duplicate blocks on multi-core splits, and
            # (c) the ragged last-lane tail.  jnp.where (select) so garbage /
            # pad contents (even NaN/Inf) never propagate.
            local_row = jax.lax.broadcasted_iota(jnp.int32, (tile_r, LANES), 0)
            lane = jax.lax.broadcasted_iota(jnp.int32, (tile_r, LANES), 1)
            flat_idx = (row_start + local_row) * LANES + lane
            masked = jnp.where(flat_idx < n_valid, hinge, 0.0)
            acc_ref[...] += fold(masked)

    return kernel


def pairwise_loss(pos_out: jax.Array, neg_out: jax.Array) -> jax.Array:
    assert pos_out.shape == neg_out.shape
    n = int(pos_out.size)
    assert n > 0
    dtype = pos_out.dtype
    itemsize = jnp.dtype(dtype).itemsize

    kind = _device_kind()
    num_partials = _num_core_partials(kind)
    use_bf16 = (dtype == jnp.bfloat16) and _has_bf16_valu(kind)
    compute_dtype = jnp.bfloat16 if use_bf16 else jnp.float32

    # ---- flatten; zero-copy reshape when lane-aligned, minimal pad otherwise
    flat_pos = pos_out.reshape(-1)
    flat_neg = neg_out.reshape(-1)
    rows = _cdiv(n, LANES)
    if n != rows * LANES:
        # Ragged tail: one small zero-pad up to an (8*128)-aligned size.  The
        # padded elements are excluded by the in-kernel mask (flat_idx < n),
        # so the pad value is irrelevant.
        rows = _round_up(rows, SUBLANES)
        pad = rows * LANES - n
        flat_pos = jnp.pad(flat_pos, (0, pad))
        flat_neg = jnp.pad(flat_neg, (0, pad))
    pos2d = flat_pos.reshape(rows, LANES)
    neg2d = flat_neg.reshape(rows, LANES)

    # ---- tiling (static, Python-side) ---------------------------------------
    max_tile_rows = max(SUBLANES,
                        (MAX_TILE_BYTES // (LANES * itemsize)) // SUBLANES * SUBLANES)
    per_core_rows = _cdiv(rows, num_partials)
    tile_r = min(max_tile_rows, _round_up(per_core_rows, SUBLANES))
    steps = _cdiv(per_core_rows, tile_r)
    nblocks = _cdiv(rows, tile_r)         # real row-blocks present in the array
    full_rows = n // LANES                # rows that are valid across all 128 lanes

    def in_index(c, i):
        # Clamp so duplicate blocks (when num_partials*steps > nblocks) still
        # DMA in-bounds data; their contribution is zeroed by the kernel mask.
        return (jnp.minimum(c * steps + i, nblocks - 1), 0)

    in_spec = pl.BlockSpec((tile_r, LANES), in_index)
    out_spec = pl.BlockSpec((SUBLANES, LANES), lambda c, i: (c, 0))

    kernel = _make_kernel(tile_r, steps, full_rows, n, compute_dtype)

    partials = pl.pallas_call(
        kernel,
        out_shape=jax.ShapeDtypeStruct((num_partials * SUBLANES, LANES), jnp.float32),
        grid_spec=pltpu.PrefetchScalarGridSpec(
            num_scalar_prefetch=0,
            grid=(num_partials, steps),
            in_specs=[in_spec, in_spec],
            # Per-partial resident (8,128) f32 accumulator block.
            out_specs=out_spec,
        ),
        compiler_params=pltpu.CompilerParams(
            dimension_semantics=("parallel", "arbitrary"),
            vmem_limit_bytes=VMEM_LIMIT_BYTES,
        ),
        cost_estimate=pl.CostEstimate(
            flops=4 * n,
            transcendentals=0,
            bytes_accessed=2 * n * itemsize + num_partials * SUBLANES * LANES * 4,
        ),
    )(pos2d, neg2d)

    # Tiny final cross-lane/sublane reduce + divide in the wrapper.
    return jnp.sum(partials) / jnp.float32(n)


def pairwise_loss_ref(pos_out, neg_out):
    pos = pos_out.astype(jnp.float32)
    neg = neg_out.astype(jnp.float32)
    return jnp.mean(jnp.maximum(1.0 - pos + neg, 0.0))


if __name__ == "__main__":
    key = jax.random.PRNGKey(0)
    k_pos, k_neg = jax.random.split(key)

    # Lane-aligned f32 scores: zero-copy path, no masking at runtime.
    pos_out = jax.random.normal(k_pos, (16, 128), dtype=jnp.float32)
    neg_out = jax.random.normal(k_neg, (16, 128), dtype=jnp.float32)
    loss = pairwise_loss(pos_out, neg_out)
    jax.block_until_ready(loss)
    ref = pairwise_loss_ref(pos_out, neg_out)
    assert jnp.allclose(loss, ref, atol=1e-5, rtol=1e-5), (loss, ref)

    # Ragged bf16 scores: minimal pad + in-kernel tail masking (+ bf16 hinge
    # on chips with a bf16 VPU).
    k_pos2, k_neg2 = jax.random.split(jax.random.PRNGKey(1))
    pos_b = jax.random.normal(k_pos2, (10, 37), dtype=jnp.bfloat16)
    neg_b = jax.random.normal(k_neg2, (10, 37), dtype=jnp.bfloat16)
    loss_b = pairwise_loss(pos_b, neg_b)
    jax.block_until_ready(loss_b)
    ref_b = pairwise_loss_ref(pos_b, neg_b)
    assert jnp.allclose(loss_b, ref_b, atol=2e-2, rtol=2e-2), (loss_b, ref_b)

    print("KERNEL_OK")
</pallas_src>

<mosaic_0001>
module attributes {stable_mosaic.version = 11 : i64} {
  func.func @kernel(%arg0: i32, %arg1: i32, %arg2: memref<16x128xf32, #tpu.memory_space<vmem>>, %arg3: memref<16x128xf32, #tpu.memory_space<vmem>>, %arg4: memref<8x128xf32, #tpu.memory_space<vmem>>) attributes {dimension_semantics = [#tpu.dimension_semantics<parallel>, #tpu.dimension_semantics<arbitrary>], iteration_bounds = array<i64: 1, 1>, scalar_prefetch = 0 : i64, scratch_operands = 0 : i64, tpu.core_type = #tpu.core_type<tc>, window_params = [{transform_indices = @transform_0, window_bounds = array<i64: 16, 128>}, {transform_indices = @transform_1, window_bounds = array<i64: 16, 128>}, {transform_indices = @transform_2, window_bounds = array<i64: 8, 128>}]} {
    %c0_i32 = arith.constant 0 : i32
    %0 = arith.cmpi eq, %arg1, %c0_i32 : i32
    %1 = arith.extui %0 : i1 to i32
    %c0_i32_0 = arith.constant 0 : i32
    %2 = arith.cmpi ne, %1, %c0_i32_0 : i32
    scf.if %2 {
      %cst_9 = arith.constant 0.000000e+00 : f32
      %20 = vector.broadcast %cst_9 : f32 to vector<8x128xf32>
      %c0_10 = arith.constant 0 : index
      %c0_11 = arith.constant 0 : index
      %21 = vector.load %arg4[%c0_10, %c0_11] : memref<8x128xf32, #tpu.memory_space<vmem>>, vector<8x128xf32>
      tpu.vector_store %arg4[%c0_10, %c0_11], %20 {strides = array<i32>} : memref<8x128xf32, #tpu.memory_space<vmem>>, vector<8x128xf32>,
    } else {
    }
    %c0 = arith.constant 0 : index
    %c0_1 = arith.constant 0 : index
    %3 = vector.load %arg2[%c0, %c0_1] : memref<16x128xf32, #tpu.memory_space<vmem>>, vector<16x128xf32>
    %c0_2 = arith.constant 0 : index
    %c0_3 = arith.constant 0 : index
    %4 = vector.load %arg3[%c0_2, %c0_3] : memref<16x128xf32, #tpu.memory_space<vmem>>, vector<16x128xf32>
    %cst = arith.constant 1.000000e+00 : f32
    %5 = vector.broadcast %cst : f32 to vector<16x128xf32>
    %6 = arith.subf %5, %3 : vector<16x128xf32>
    %7 = arith.addf %6, %4 : vector<16x128xf32>
    %cst_4 = arith.constant 0.000000e+00 : f32
    %8 = vector.broadcast %cst_4 : f32 to vector<16x128xf32>
    %9 = arith.maximumf %7, %8 : vector<16x128xf32>
    %c1_i32 = arith.constant 1 : i32
    %10 = arith.muli %arg0, %c1_i32 : i32
    %11 = arith.addi %10, %arg1 : i32
    %c16_i32 = arith.constant 16 : i32
    %12 = arith.muli %11, %c16_i32 : i32
    %c16_i32_5 = arith.constant 16 : i32
    %13 = arith.addi %12, %c16_i32_5 : i32
    %c16_i32_6 = arith.constant 16 : i32
    %14 = arith.cmpi sgt, %13, %c16_i32_6 : i32
    %true = arith.constant true
    %15 = arith.xori %14, %true : i1
    %16 = arith.extui %15 : i1 to i32
    %c0_i32_7 = arith.constant 0 : i32
    %17 = arith.cmpi ne, %16, %c0_i32_7 : i32
    scf.if %17 {
      %c0_9 = arith.constant 0 : index
      %c0_10 = arith.constant 0 : index
      %20 = vector.load %arg4[%c0_9, %c0_10] : memref<8x128xf32, #tpu.memory_space<vmem>>, vector<8x128xf32>
      %21 = vector.shape_cast %9 : vector<16x128xf32> to vector<2x8x128xf32>
      %cst_11 = arith.constant dense<0.000000e+00> : vector<8x128xf32>
      %22 = vector.multi_reduction <add>, %21, %cst_11 [0] : vector<2x8x128xf32> to vector<8x128xf32>
      %23 = arith.addf %20, %22 : vector<8x128xf32>
      %c0_12 = arith.constant 0 : index
      %c0_13 = arith.constant 0 : index
      %24 = vector.load %arg4[%c0_12, %c0_13] : memref<8x128xf32, #tpu.memory_space<vmem>>, vector<8x128xf32>
      tpu.vector_store %arg4[%c0_12, %c0_13], %23 {strides = array<i32>} : memref<8x128xf32, #tpu.memory_space<vmem>>, vector<8x128xf32>,
    } else {
    }
    %18 = arith.extui %14 : i1 to i32
    %c0_i32_8 = arith.constant 0 : i32
    %19 = arith.cmpi ne, %18, %c0_i32_8 : i32
    scf.if %19 {
      %20 = tpu.iota {dimensions = array<i32: 0>} : vector<16x128xi32>
      %21 = tpu.iota {dimensions = array<i32: 1>} : vector<16x128xi32>
      %22 = vector.broadcast %12 : i32 to vector<16x128xi32>
      %23 = arith.addi %22, %20 : vector<16x128xi32>
      %c128_i32 = arith.constant 128 : i32
      %24 = vector.broadcast %c128_i32 : i32 to vector<16x128xi32>
      %25 = arith.muli %23, %24 : vector<16x128xi32>
      %26 = arith.addi %25, %21 : vector<16x128xi32>
      %c2048_i32 = arith.constant 2048 : i32
      %27 = vector.broadcast %c2048_i32 : i32 to vector<16x128xi32>
      %28 = arith.cmpi slt, %26, %27 : vector<16x128xi32>
      %cst_9 = arith.constant 0.000000e+00 : f32
      %29 = vector.broadcast %cst_9 : f32 to vector<16x128xf32>
      %30 = arith.select %28, %9, %29 : vector<16x128xi1>, vector<16x128xf32>
      %c0_10 = arith.constant 0 : index
      %c0_11 = arith.constant 0 : index
      %31 = vector.load %arg4[%c0_10, %c0_11] : memref<8x128xf32, #tpu.memory_space<vmem>>, vector<8x128xf32>
      %32 = vector.shape_cast %30 : vector<16x128xf32> to vector<2x8x128xf32>
      %cst_12 = arith.constant dense<0.000000e+00> : vector<8x128xf32>
      %33 = vector.multi_reduction <add>, %32, %cst_12 [0] : vector<2x8x128xf32> to vector<8x128xf32>
      %34 = arith.addf %31, %33 : vector<8x128xf32>
      %c0_13 = arith.constant 0 : index
      %c0_14 = arith.constant 0 : index
      %35 = vector.load %arg4[%c0_13, %c0_14] : memref<8x128xf32, #tpu.memory_space<vmem>>, vector<8x128xf32>
      tpu.vector_store %arg4[%c0_13, %c0_14], %34 {strides = array<i32>} : memref<8x128xf32, #tpu.memory_space<vmem>>, vector<8x128xf32>,
    } else {
    }
    return
  }
  func.func @transform_0(%arg0: i32, %arg1: i32) -> (i32, i32) {
    %c1_i32 = arith.constant 1 : i32
    %0 = arith.muli %arg0, %c1_i32 : i32
    %1 = arith.addi %0, %arg1 : i32
    %c0_i32 = arith.constant 0 : i32
    %2 = arith.minsi %1, %c0_i32 : i32
    %c0_i32_0 = arith.constant 0 : i32
    %c0_i32_1 = arith.constant 0 : i32
    return %2, %c0_i32_0 : i32, i32
  }
  func.func @transform_1(%arg0: i32, %arg1: i32) -> (i32, i32) {
    %c1_i32 = arith.constant 1 : i32
    %0 = arith.muli %arg0, %c1_i32 : i32
    %1 = arith.addi %0, %arg1 : i32
    %c0_i32 = arith.constant 0 : i32
    %2 = arith.minsi %1, %c0_i32 : i32
    %c0_i32_0 = arith.constant 0 : i32
    %c0_i32_1 = arith.constant 0 : i32
    return %2, %c0_i32_0 : i32, i32
  }
  func.func @transform_2(%arg0: i32, %arg1: i32) -> (i32, i32) {
    %c0_i32 = arith.constant 0 : i32
    %c0_i32_0 = arith.constant 0 : i32
    return %arg0, %c0_i32 : i32, i32
  }
}

</mosaic_0001>

<bundles_post_ra>
// kernel: tpu_custom_call.1
= control target key start
LH: loop header
LB: loop body
LE: loop exit
PB: predicated region body
PF: predicated region fallthrough
CT: control target
= control target key end

     0   :  { %7 = vsyncpa [#allocation3], 0  ;;  %s264_s0 = inlined_call_operand.hbm [shape: f32[16,128], index: 0, kind: input, shape index: {}]   ;;  %s265_s1 = inlined_call_operand.hbm [shape: f32[16,128], index: 1, kind: input, shape index: {}]   ;;  %s266_s2 = inlined_call_operand.hbm [shape: f32[8,128], index: 2, kind: output, shape index: {}]  }
   0x1   :  { %8 = vsyncpa [#allocation6], 0 }
   0x2   :  { %9 = vsyncpa [#allocation4], 0  ;;  %s208_s9 = smov [#allocation2]   ;;  %s136_s13 = scalar_lea.hbm %s264_s0, 256 }
   0x3   :  { %s21_s10 = sshll.u32 %s208_s9, 4  ;;  %p137_p0 = scmp.ne.s32.totalorder %s264_s0, %s136_s13  ;;  %s22_s10 = int_to_ptr.vmem [resolvable:$true] %s21_s10 }
   0x4   :  { %p140_p1 = scmp.lt.u32.totalorder %s136_s13, %s264_s0 }
   0x6   :  { %p142_p2 = pnand %p140_p1, %p137_p0 }
   0x8   :  { %145 = shalt.err (!%p142_p2)
}
   0x9   :  { %s146_s18 = scalar_lea.vmem %s22_s10, 256  ;;  %p151_p4 = scmp.lt.s32.totalorder %s22_s10, %s22_s10 }
   0xa   :  { %p147_p3 = scmp.ne.s32.totalorder %s22_s10, %s146_s18  ;;  %p152_p5 = scmp.lt.s32.totalorder %s146_s18, %s146_s18 }
   0xc   :  { %p153_p6 = por %p152_p5, %p151_p4 }
   0xe   :  { %p154_p7 = pnand %p153_p6, %p147_p3 }
  0x10   :  { %157 = shalt.err (!%p154_p7)
}
  0x11   :  { %s209_s19 = smov 128   ;;  %s210_s20 = smov 8  }
  0x12   :  { %27 = dma.hbm_to_vmem [thread:$0]  %s264_s0, 256, %s22_s10, [#allocation3], %s209_s19, %s209_s19, %s210_s20  }
  0x13   :  { %s211_s23 = smov [#allocation5]   ;;  %s158_s27 = scalar_lea.hbm %s265_s1, 256 }
  0x14   :  { %s39_s24 = sshll.u32 %s211_s23, 4  ;;  %p159_p8 = scmp.ne.s32.totalorder %s265_s1, %s158_s27  ;;  %s40_s24 = int_to_ptr.vmem [resolvable:$true] %s39_s24 }
  0x15   :  { %p162_p9 = scmp.lt.u32.totalorder %s158_s27, %s265_s1 }
  0x17   :  { %p164_p10 = pnand %p162_p9, %p159_p8 }
  0x19   :  { %167 = shalt.err (!%p164_p10)
}
  0x1a   :  { %s168_s4 = scalar_lea.vmem %s40_s24, 256  ;;  %p173_p12 = scmp.lt.s32.totalorder %s40_s24, %s40_s24 }
  0x1b   :  { %p169_p11 = scmp.ne.s32.totalorder %s40_s24, %s168_s4  ;;  %p174_p13 = scmp.lt.s32.totalorder %s168_s4, %s168_s4 }
  0x1d   :  { %p175_p0 = por %p174_p13, %p173_p12 }
  0x1f   :  { %p176_p1 = pnand %p175_p0, %p169_p11 }
  0x21   :  { %179 = shalt.err (!%p176_p1)
}
  0x22   :  { %45 = dma.hbm_to_vmem [thread:$0]  %s265_s1, 256, %s40_s24, [#allocation6], %s209_s19, %s209_s19, %s210_s20  }
  0x23   :  { %202 = dma.done.wait [#allocation3], 256  }
  0x24   :  { %203 = vsyncadd [#allocation3], 4294967040 }
  0x25   :  { %204 = dma.done.wait [#allocation6], 256  }
  0x26   :  { %205 = vsyncadd [#allocation6], 4294967040  ;;  %v65_v0 = vld [vmem:[#allocation2] sm:$0xff]  ;;  %v66_v1 = vld [vmem:[#allocation2 + $0x8] sm:$0xff]  ;;  %s212_s6 = smov [#allocation7]  }
  0x27   :  { %v67_v2 = vld [vmem:[#allocation5] sm:$0xff]  ;;  %v68_v3 = vld [vmem:[#allocation5 + $0x8] sm:$0xff]  ;;  %v69_v4 = vsub.f32 1.0, %v65_v0  ;;  %v70_v5 = vsub.f32 1.0, %v66_v1  ;;  %s116_s7 = sshll.u32 %s212_s6, 4  ;;  %s117_s7 = int_to_ptr.vmem [resolvable:$true] %s116_s7 }
  0x28   :  { %s180_s1 = scalar_lea.vmem %s117_s7, 128  ;;  %p185_p3 = scmp.lt.s32.totalorder %s117_s7, %s117_s7 }
  0x29   :  { %v71_v6 = vadd.f32 %v69_v4, %v67_v2  ;;  %v72_v7 = vadd.f32 %v70_v5, %v68_v3  ;;  %p181_p2 = scmp.ne.s32.totalorder %s117_s7, %s180_s1  ;;  %p186_p4 = scmp.lt.s32.totalorder %s180_s1, %s180_s1 }
  0x2b   :  { %v73_v8 = vmax.f32 %v71_v6, 0.0  ;;  %v74_v9 = vmax.f32 %v72_v7, 0.0  ;;  %p187_p5 = por %p186_p4, %p185_p3 }
  0x2d   :  { %v84_v10 = vadd.f32 %v74_v9, %v73_v8  ;;  %p188_p6 = pnand %p187_p5, %p181_p2 }
  0x2f   :  { %86 = vst [vmem:[#allocation7] sm:$0xff] %v84_v10 }
  0x30   :  { %191 = shalt.err (!%p188_p6)
}
  0x31   :  { %s192_s10 = scalar_lea.hbm %s266_s2, 128 }
  0x32   :  { %p193_p7 = scmp.ne.s32.totalorder %s266_s2, %s192_s10  ;;  %p196_p8 = scmp.lt.u32.totalorder %s192_s10, %s266_s2 }
  0x34   :  { %p198_p9 = pnand %p196_p8, %p193_p7 }
  0x36   :  { %201 = shalt.err (!%p198_p9)
}
  0x37   :  { %119 = dma.vmem_to_hbm [thread:$0]  %s117_s7, 128, %s266_s2, [#allocation4]  }
  0x38   :  { %206 = dma.done.wait [#allocation4], 128  }
  0x39   :  { %207 = vsyncadd [#allocation4], 4294967168 }
  0x3a   :  { %123 = vsyncpa [#allocation3], 1 }
  0x3b   :  { %124 = vsyncpa [#allocation6], 1 }
  0x3c   :  { %125 = vsyncpa [#allocation4], 1 }

</bundles_post_ra>
